<compile_context>
chip_gen: v7x
topology: tpu7x:2x2x1
jax: 0.10.0
libtpu: 0.0.40
codegen_flags: <defaults>
</compile_context>

<pallas_src>
import jax
import jax.numpy as jnp
from jax.experimental import pallas as pl
from jax.experimental.pallas import tpu as pltpu

_LANE = 128
_SUBLANE = 8


def _round_up(x, m):
    return ((x + m - 1) // m) * m


# --------------------------------------------------------------------------- #
# Kernel
# --------------------------------------------------------------------------- #
def clf_head_kernel(x_ref, w1_ref, b1_ref, w2_ref, b2_ref, o_ref):
    # TODO(synk): training-mode Dropout (pltpu.prng_random_bits mask) not
    # implemented; eval-mode identity semantics are used.
    w1 = w1_ref[...]                       # already padded + cast host-side
    w2 = w2_ref[...]
    x = x_ref[...].astype(w1.dtype)        # only the streamed tile is cast here

    # Layer 1: Linear (MXU, f32 accumulate) + bias + tanh (VPU/EUP, f32).
    h = jnp.dot(x, w1, preferred_element_type=jnp.float32)
    h = jnp.tanh(h + b1_ref[...])          # b1 is [1, H1p], broadcasts over rows

    # Layer 2: Linear (no trailing activation, matches layers[:-1]).
    o = jnp.dot(h.astype(w2.dtype), w2, preferred_element_type=jnp.float32)
    o = o + b2_ref[...]                    # b2 is [1, Lp]
    o_ref[...] = o.astype(o_ref.dtype)


# --------------------------------------------------------------------------- #
# Parameter preparation (host-side, once per model — NOT per forward call)
# --------------------------------------------------------------------------- #
def prepare_clf_head_params(w1, b1, w2, b2, *, compute_dtype=jnp.float32,
                            lane_pad=_LANE):
    """Pad weights/biases to lane-dense shapes and cast weights once.

    w1: [H0, H1] (transposed vs. PyTorch), b1: [H1], w2: [H1, L], b2: [L].
    compute_dtype: jnp.bfloat16 recommended on v5e/v6e/v7x (f32 accumulation
    is preserved in-kernel); jnp.float32 matches the PyTorch reference.
    """
    H0, H1 = w1.shape
    L = w2.shape[1]
    H0p = _round_up(H0, lane_pad)
    H1p = _round_up(H1, lane_pad)
    Lp = _round_up(L, lane_pad)

    wdt = jnp.dtype(compute_dtype) if compute_dtype is not None else w1.dtype
    w1p = jnp.zeros((H0p, H1p), wdt).at[:H0, :H1].set(w1.astype(wdt))
    w2p = jnp.zeros((H1p, Lp), wdt).at[:H1, :L].set(w2.astype(wdt))
    # Biases stay f32 (tiny; bias add + tanh are done in f32 in the kernel).
    b1p = jnp.zeros((1, H1p), jnp.float32).at[0, :H1].set(b1.astype(jnp.float32))
    b2p = jnp.zeros((1, Lp), jnp.float32).at[0, :L].set(b2.astype(jnp.float32))

    return dict(w1=w1p, b1=b1p, w2=w2p, b2=b2p,
                H0=H0, H1=H1, L=L, H0p=H0p, H1p=H1p, Lp=Lp)


def _resident_spec(shape):
    """Constant-index (VMEM-resident) operand; single-buffered when supported."""
    index_map = lambda i, _shape=shape: (0,) * len(_shape)
    try:
        return pl.BlockSpec(shape, index_map, pipeline_mode=pl.Buffered(1))
    except (AttributeError, TypeError):
        # Older jax without pipeline_mode / Buffered: fall back to default.
        return pl.BlockSpec(shape, index_map)


# --------------------------------------------------------------------------- #
# Forward
# --------------------------------------------------------------------------- #
def clf_head_forward(x, params, *, block_batch=512, slice_output=True):
    """x: [B, H0]; params: output of prepare_clf_head_params."""
    B, H0 = x.shape
    assert H0 == params["H0"], "feature dim mismatch with prepared params"
    H0p, H1p, Lp, L = params["H0p"], params["H1p"], params["Lp"], params["L"]

    # ---- batch tile: sublane-aligned, waste-bounded ragged tail -------------
    TB = min(block_batch, _round_up(B, _SUBLANE))
    # Shrink the tile while >25% of the padded batch would be wasted rows.
    while TB > _SUBLANE and (_round_up(B, TB) - B) * 4 > _round_up(B, TB):
        TB = max(TB // 2, _SUBLANE)
    Bp = _round_up(B, TB)

    # ---- pad the activation only if actually needed --------------------------
    if (Bp != B) or (H0p != H0):
        x_in = jnp.zeros((Bp, H0p), x.dtype).at[:B, :H0].set(x)
    else:
        x_in = x

    # ---- explicit scoped-VMEM budget -----------------------------------------
    f32b = jnp.dtype(jnp.float32).itemsize
    wbytes = sum(int(params[k].size) * params[k].dtype.itemsize
                 for k in ("w1", "b1", "w2", "b2"))         # single-buffered
    stream = 2 * TB * H0p * x_in.dtype.itemsize \
           + 2 * TB * Lp * jnp.dtype(x.dtype).itemsize      # double-buffered io
    scratch = TB * (H1p + Lp) * f32b                         # in-body f32 temps
    vmem_limit = int(1.25 * (wbytes + stream + scratch)) + (4 << 20)
    vmem_limit = max(vmem_limit, 16 << 20)
    vmem_limit = min(vmem_limit, 64 << 20)                   # v7x physical/TC

    out = pl.pallas_call(
        clf_head_kernel,
        out_shape=jax.ShapeDtypeStruct((Bp, Lp), x.dtype),
        grid_spec=pltpu.PrefetchScalarGridSpec(
            num_scalar_prefetch=0,
            grid=(Bp // TB,),
            in_specs=[
                # activation stream: one batch tile per step (double-buffered)
                pl.BlockSpec((TB, H0p), lambda i: (i, 0)),
                # weights / biases: constant index -> VMEM-resident, 1 buffer
                _resident_spec((H0p, H1p)),
                _resident_spec((1, H1p)),
                _resident_spec((H1p, Lp)),
                _resident_spec((1, Lp)),
            ],
            out_specs=pl.BlockSpec((TB, Lp), lambda i: (i, 0)),
        ),
        compiler_params=pltpu.CompilerParams(
            dimension_semantics=("parallel",),   # shard batch over 2 TCs on v7x
            vmem_limit_bytes=vmem_limit,
        ),
    )(x_in, params["w1"], params["b1"], params["w2"], params["b2"])

    if slice_output:
        return out[:B, :L]
    return out          # padded (Bp, Lp); consumer may slice lazily


# --------------------------------------------------------------------------- #
# Init helper (PyTorch nn.Linear default init), weight returned as [in, out]
# --------------------------------------------------------------------------- #
def init_linear(key, in_features, out_features, dtype=jnp.float32):
    kw, kb = jax.random.split(key)
    bound = 1.0 / jnp.sqrt(jnp.asarray(in_features, dtype))
    w = jax.random.uniform(kw, (in_features, out_features), dtype,
                           minval=-bound, maxval=bound)
    b = jax.random.uniform(kb, (out_features,), dtype,
                           minval=-bound, maxval=bound)
    return w, b


if __name__ == "__main__":
    # ClfHead(hid_sizes=[32, 16], num_labels=4, activation='tanh', dropout=True)
    B, H0, H1, L = 8, 32, 16, 4

    key = jax.random.PRNGKey(0)
    kx, k1, k2 = jax.random.split(key, 3)

    x = jax.random.normal(kx, (B, H0), jnp.float32)
    w1, b1 = init_linear(k1, H0, H1)
    w2, b2 = init_linear(k2, H1, L)

    # Reference in plain JAX (eval-mode dropout == identity).
    ref = jnp.tanh(x @ w1 + b1) @ w2 + b2

    # f32 path (numerics match the PyTorch fp32 reference).
    params_f32 = prepare_clf_head_params(w1, b1, w2, b2,
                                         compute_dtype=jnp.float32)
    out = jax.block_until_ready(clf_head_forward(x, params_f32))
    assert out.shape == (B, L)
    assert jnp.allclose(out, ref, atol=1e-5, rtol=1e-5)

    # bf16 MXU path (recommended default on v5e/v6e/v7x) -- looser tolerance.
    params_bf16 = prepare_clf_head_params(w1, b1, w2, b2,
                                          compute_dtype=jnp.bfloat16)
    out_bf16 = jax.block_until_ready(clf_head_forward(x, params_bf16))
    assert out_bf16.shape == (B, L)
    assert jnp.allclose(out_bf16, ref, atol=3e-2, rtol=3e-2)

    print("KERNEL_OK")
</pallas_src>

<mosaic_0001>
module attributes {stable_mosaic.version = 11 : i64} {
  func.func @clf_head_kernel(%arg0: i32, %arg1: memref<8x128xf32, #tpu.memory_space<vmem>>, %arg2: memref<128x128xf32, #tpu.memory_space<vmem>>, %arg3: memref<1x128xf32, #tpu.memory_space<vmem>>, %arg4: memref<128x128xf32, #tpu.memory_space<vmem>>, %arg5: memref<1x128xf32, #tpu.memory_space<vmem>>, %arg6: memref<8x128xf32, #tpu.memory_space<vmem>>) attributes {dimension_semantics = [#tpu.dimension_semantics<parallel>], iteration_bounds = array<i64: 1>, scalar_prefetch = 0 : i64, scratch_operands = 0 : i64, tpu.core_type = #tpu.core_type<tc>, window_params = [{transform_indices = @transform_0, window_bounds = array<i64: 8, 128>}, {pipeline_mode = #tpu.pipeline_mode<synchronous>, transform_indices = @transform_1, window_bounds = array<i64: 128, 128>}, {pipeline_mode = #tpu.pipeline_mode<synchronous>, transform_indices = @transform_2, window_bounds = array<i64: 1, 128>}, {pipeline_mode = #tpu.pipeline_mode<synchronous>, transform_indices = @transform_3, window_bounds = array<i64: 128, 128>}, {pipeline_mode = #tpu.pipeline_mode<synchronous>, transform_indices = @transform_4, window_bounds = array<i64: 1, 128>}, {transform_indices = @transform_5, window_bounds = array<i64: 8, 128>}]} {
    %c0 = arith.constant 0 : index
    %c0_0 = arith.constant 0 : index
    %0 = vector.load %arg2[%c0, %c0_0] : memref<128x128xf32, #tpu.memory_space<vmem>>, vector<128x128xf32>
    %c0_1 = arith.constant 0 : index
    %c0_2 = arith.constant 0 : index
    %1 = vector.load %arg4[%c0_1, %c0_2] : memref<128x128xf32, #tpu.memory_space<vmem>>, vector<128x128xf32>
    %c0_3 = arith.constant 0 : index
    %c0_4 = arith.constant 0 : index
    %2 = vector.load %arg1[%c0_3, %c0_4] : memref<8x128xf32, #tpu.memory_space<vmem>>, vector<8x128xf32>
    %cst = arith.constant dense<0.000000e+00> : vector<8x128xf32>
    %3 = tpu.matmul %2, %0, %cst {dimension_numbers = #tpu.dot_dimension_numbers<[1], [0], [0], [1], [0, 0, 1, 1], [], []>} : vector<8x128xf32>, vector<128x128xf32>, vector<8x128xf32> -> vector<8x128xf32>
    %c0_5 = arith.constant 0 : index
    %c0_6 = arith.constant 0 : index
    %4 = vector.load %arg3[%c0_5, %c0_6] : memref<1x128xf32, #tpu.memory_space<vmem>>, vector<1x128xf32>
    %5 = vector.broadcast %4 : vector<1x128xf32> to vector<8x128xf32>
    %6 = arith.addf %3, %5 : vector<8x128xf32>
    %7 = math.tanh %6 : vector<8x128xf32>
    %cst_7 = arith.constant dense<0.000000e+00> : vector<8x128xf32>
    %8 = tpu.matmul %7, %1, %cst_7 {dimension_numbers = #tpu.dot_dimension_numbers<[1], [0], [0], [1], [0, 0, 1, 1], [], []>} : vector<8x128xf32>, vector<128x128xf32>, vector<8x128xf32> -> vector<8x128xf32>
    %c0_8 = arith.constant 0 : index
    %c0_9 = arith.constant 0 : index
    %9 = vector.load %arg5[%c0_8, %c0_9] : memref<1x128xf32, #tpu.memory_space<vmem>>, vector<1x128xf32>
    %10 = vector.broadcast %9 : vector<1x128xf32> to vector<8x128xf32>
    %11 = arith.addf %8, %10 : vector<8x128xf32>
    %c0_10 = arith.constant 0 : index
    %c0_11 = arith.constant 0 : index
    %12 = vector.load %arg6[%c0_10, %c0_11] : memref<8x128xf32, #tpu.memory_space<vmem>>, vector<8x128xf32>
    tpu.vector_store %arg6[%c0_10, %c0_11], %11 {strides = array<i32>} : memref<8x128xf32, #tpu.memory_space<vmem>>, vector<8x128xf32>,
    return
  }
  func.func @transform_0(%arg0: i32) -> (i32, i32) {
    %c0_i32 = arith.constant 0 : i32
    %c0_i32_0 = arith.constant 0 : i32
    return %arg0, %c0_i32 : i32, i32
  }
  func.func @transform_1(%arg0: i32) -> (i32, i32) {
    %c0_i32 = arith.constant 0 : i32
    %c0_i32_0 = arith.constant 0 : i32
    %c0_i32_1 = arith.constant 0 : i32
    return %c0_i32, %c0_i32_0 : i32, i32
  }
  func.func @transform_2(%arg0: i32) -> (i32, i32) {
    %c0_i32 = arith.constant 0 : i32
    %c0_i32_0 = arith.constant 0 : i32
    %c0_i32_1 = arith.constant 0 : i32
    return %c0_i32, %c0_i32_0 : i32, i32
  }
  func.func @transform_3(%arg0: i32) -> (i32, i32) {
    %c0_i32 = arith.constant 0 : i32
    %c0_i32_0 = arith.constant 0 : i32
    %c0_i32_1 = arith.constant 0 : i32
    return %c0_i32, %c0_i32_0 : i32, i32
  }
  func.func @transform_4(%arg0: i32) -> (i32, i32) {
    %c0_i32 = arith.constant 0 : i32
    %c0_i32_0 = arith.constant 0 : i32
    %c0_i32_1 = arith.constant 0 : i32
    return %c0_i32, %c0_i32_0 : i32, i32
  }
  func.func @transform_5(%arg0: i32) -> (i32, i32) {
    %c0_i32 = arith.constant 0 : i32
    %c0_i32_0 = arith.constant 0 : i32
    return %arg0, %c0_i32 : i32, i32
  }
}

</mosaic_0001>

<bundles_post_ra>
// kernel: tpu_custom_call.1
= control target key start
LH: loop header
LB: loop body
LE: loop exit
PB: predicated region body
PF: predicated region fallthrough
CT: control target
= control target key end

     0   :  { %10 = vsyncpa [#allocation3], 0  ;;  %s639_s0 = inlined_call_operand.hbm [shape: f32[8,128], index: 0, kind: input, shape index: {}]   ;;  %s640_s1 = inlined_call_operand.hbm [shape: f32[128,128], index: 1, kind: input, shape index: {}]   ;;  %s641_s2 = inlined_call_operand.vmem [shape: f32[1,128], index: 2, kind: input, shape index: {}]   ;;  %s642_s3 = inlined_call_operand.hbm [shape: f32[128,128], index: 3, kind: input, shape index: {}]   ;;  %s643_s4 = inlined_call_operand.vmem [shape: f32[1,128], index: 4, kind: input, shape index: {}]   ;;  %s644_s5 = inlined_call_operand.hbm [shape: f32[8,128], index: 5, kind: output, shape index: {}]  }
   0x1   :  { %11 = vsyncpa [#allocation6], 0 }
   0x2   :  { %12 = vsyncpa [#allocation4], 0  ;;  %s524_s18 = smov [#allocation5]   ;;  %s430_s22 = scalar_lea.hbm %s640_s1, 2048 }
   0x3   :  { %s28_s19 = sshll.u32 %s524_s18, 4  ;;  %p431_p0 = scmp.ne.s32.totalorder %s640_s1, %s430_s22  ;;  %s29_s19 = int_to_ptr.vmem [resolvable:$true] %s28_s19 }
   0x4   :  { %p434_p1 = scmp.lt.u32.totalorder %s430_s22, %s640_s1 }
   0x6   :  { %p436_p2 = pnand %p434_p1, %p431_p0 }
   0x8   :  { %439 = shalt.err (!%p436_p2)
}
   0x9   :  { %s440_s27 = scalar_lea.vmem %s29_s19, 2048  ;;  %p445_p4 = scmp.lt.s32.totalorder %s29_s19, %s29_s19 }
   0xa   :  { %p441_p3 = scmp.ne.s32.totalorder %s29_s19, %s440_s27  ;;  %p446_p5 = scmp.lt.s32.totalorder %s440_s27, %s440_s27 }
   0xc   :  { %p447_p6 = por %p446_p5, %p445_p4 }
   0xe   :  { %p448_p7 = pnand %p447_p6, %p441_p3 }
  0x10   :  { %451 = shalt.err (!%p448_p7)
}
  0x11   :  { %s525_s28 = smov 128   ;;  %s526_s29 = smov 8  }
  0x12   :  { %34 = dma.hbm_to_vmem [thread:$0]  %s640_s1, 2048, %s29_s19, [#allocation6], %s525_s28, %s525_s28, %s526_s29  }
  0x13   :  { %s527_s7 = smov [#allocation2]   ;;  %s528_s9 = smov [#allocation7]  }
  0x14   :  { %s19_s8 = sshll.u32 %s527_s7, 4  ;;  %s42_s10 = sshll.u32 %s528_s9, 4  ;;  %s20_s8 = int_to_ptr.vmem [resolvable:$true] %s19_s8  ;;  %s43_s10 = int_to_ptr.vmem [resolvable:$true] %s42_s10 }
  0x15   :  { %s452_s13 = scalar_lea.hbm %s639_s0, 128 }
  0x16   :  { %p453_p8 = scmp.ne.s32.totalorder %s639_s0, %s452_s13  ;;  %p456_p9 = scmp.lt.u32.totalorder %s452_s13, %s639_s0 }
  0x18   :  { %p458_p10 = pnand %p456_p9, %p453_p8 }
  0x1a   :  { %461 = shalt.err (!%p458_p10)
}
  0x1b   :  { %s462_s1 = scalar_lea.vmem %s20_s8, 128  ;;  %p467_p12 = scmp.lt.s32.totalorder %s20_s8, %s20_s8 }
  0x1c   :  { %p463_p11 = scmp.ne.s32.totalorder %s20_s8, %s462_s1  ;;  %p468_p13 = scmp.lt.s32.totalorder %s462_s1, %s462_s1 }
  0x1e   :  { %p469_p0 = por %p468_p13, %p467_p12 }
  0x20   :  { %p470_p1 = pnand %p469_p0, %p463_p11 }
  0x22   :  { %473 = shalt.err (!%p470_p1)
}
  0x23   :  { %22 = dma.hbm_to_vmem [thread:$0]  %s639_s0, 128, %s20_s8, [#allocation3]  }
  0x24   :  { %s474_s22 = scalar_lea.hbm %s642_s3, 2048 }
  0x25   :  { %p475_p2 = scmp.ne.s32.totalorder %s642_s3, %s474_s22  ;;  %p478_p3 = scmp.lt.u32.totalorder %s474_s22, %s642_s3 }
  0x27   :  { %p480_p4 = pnand %p478_p3, %p475_p2 }
  0x29   :  { %483 = shalt.err (!%p480_p4)
}
  0x2a   :  { %s484_s27 = scalar_lea.vmem %s43_s10, 2048  ;;  %p489_p6 = scmp.lt.s32.totalorder %s43_s10, %s43_s10 }
  0x2b   :  { %p485_p5 = scmp.ne.s32.totalorder %s43_s10, %s484_s27  ;;  %p490_p7 = scmp.lt.s32.totalorder %s484_s27, %s484_s27 }
  0x2d   :  { %p491_p8 = por %p490_p7, %p489_p6 }
  0x2f   :  { %p492_p9 = pnand %p491_p8, %p485_p5 }
  0x31   :  { %495 = shalt.err (!%p492_p9)
}
  0x32   :  { %48 = dma.hbm_to_vmem [thread:$0]  %s642_s3, 2048, %s43_s10, [#allocation6], %s525_s28, %s525_s28, %s526_s29  }
  0x33   :  { %518 = dma.done.wait [#allocation3], 128  }
  0x34   :  { %519 = vsyncadd [#allocation3], 4294967168 }
  0x35   :  { %520 = dma.done.wait [#allocation6], 4096  }
  0x36   :  { %521 = vsyncadd [#allocation6], 4294963200  ;;  %v529_v0 = vmov 0.0|0.0   ;;  %vm530_vm0 = vmmov 0   ;;  %v531_v1 = vmov 0.0   ;;  %v60_v2 = vld [vmem:[#allocation5] sm:$0xff] }
  0x37   :  { %371 = vmatprep.subr.bf16.mxu0 %v529_v0  ;;  %333 = vmatprep.mubr.msk.f32.mxu0 %vm530_vm0, %v531_v1  ;;  %v61_v3 = vld [vmem:[#allocation5 + $0x8] sm:$0xff]  ;;  %v62_v4 = vld [vmem:[#allocation5 + $0x10] sm:$0xff]  ;;  %v63_v6 = vld [vmem:[#allocation5 + $0x18] sm:$0xff]  ;;  %s532_s7 = smov [#allocation8]  }
  0x38   :  { %395 = vmatprep.subr.bf16.mxu1 %v529_v0  ;;  %368 = vmatprep.mubr.msk.f32.mxu1 %vm530_vm0, %v531_v1  ;;  %v372_v5 = vpack.c.bf16 %v61_v3, %v60_v2  ;;  %v375_v7 = vpack.c.bf16 %v63_v6, %v62_v4  ;;  %v64_v8 = vld [vmem:[#allocation5 + $0x20] sm:$0xff]  ;;  %v65_v9 = vld [vmem:[#allocation5 + $0x28] sm:$0xff]  ;;  %v78_v12 = vld [vmem:[#allocation7 + $0x10] sm:$0xff]  ;;  %s255_s8 = sshll.u32 %s532_s7, 4  ;;  %s256_s8 = int_to_ptr.vmem [resolvable:$true] %s255_s8 }
  0x39   :  { %v76_v10 = vld [vmem:[#allocation7] sm:$0xff]  ;;  %v77_v11 = vld [vmem:[#allocation7 + $0x8] sm:$0xff]  ;;  %v79_v13 = vld [vmem:[#allocation7 + $0x18] sm:$0xff]  ;;  %v378_v14 = vpack.c.bf16 %v65_v9, %v64_v8  ;;  %s496_s9 = scalar_lea.vmem %s256_s8, 128  ;;  %p501_p11 = scmp.lt.s32.totalorder %s256_s8, %s256_s8 }
  0x3a   :  { %373 = vmatpush3.bf16.msra.mxu0 %v372_v5  ;;  %v396_v15 = vpack.c.bf16 %v77_v11, %v76_v10  ;;  %v66_v16 = vld [vmem:[#allocation5 + $0x30] sm:$0xff]  ;;  %v67_v17 = vld [vmem:[#allocation5 + $0x38] sm:$0xff]  ;;  %v399_v18 = vpack.c.bf16 %v79_v13, %v78_v12  ;;  %v80_v19 = vld [vmem:[#allocation7 + $0x20] sm:$0xff]  ;;  %p497_p10 = scmp.ne.s32.totalorder %s256_s8, %s496_s9  ;;  %p502_p12 = scmp.lt.s32.totalorder %s496_s9, %s496_s9 }
  0x3b   :  { %374 = vmatprep.subr.bf16.mxu0 %v529_v0  ;;  %v81_v20 = vld [vmem:[#allocation7 + $0x28] sm:$0xff]  ;;  %v381_v21 = vpack.c.bf16 %v67_v17, %v66_v16  ;;  %v68_v22 = vld [vmem:[#allocation5 + $0x40] sm:$0xff]  ;;  %v82_v25 = vld [vmem:[#allocation7 + $0x30] sm:$0xff] }
  0x3c   :  { %397 = vmatpush3.bf16.msra.mxu1 %v396_v15  ;;  %v69_v23 = vld [vmem:[#allocation5 + $0x48] sm:$0xff]  ;;  %v402_v24 = vpack.c.bf16 %v81_v20, %v80_v19  ;;  %v83_v26 = vld [vmem:[#allocation7 + $0x38] sm:$0xff]  ;;  %v70_v28 = vld [vmem:[#allocation5 + $0x50] sm:$0xff]  ;;  %p503_p13 = por %p502_p12, %p501_p11 }
  0x3d   :  { %398 = vmatprep.subr.bf16.mxu1 %v529_v0  ;;  %v384_v27 = vpack.c.bf16 %v69_v23, %v68_v22  ;;  %v71_v29 = vld [vmem:[#allocation5 + $0x58] sm:$0xff]  ;;  %v405_v30 = vpack.c.bf16 %v83_v26, %v82_v25  ;;  %v84_v31 = vld [vmem:[#allocation7 + $0x40] sm:$0xff]  ;;  %v85_v32 = vld [vmem:[#allocation7 + $0x48] sm:$0xff] }
  0x3e   :  { %376 = vmatpush3.bf16.msra.mxu0 %v375_v7  ;;  %v387_v33 = vpack.c.bf16 %v71_v29, %v70_v28  ;;  %v72_v34 = vld [vmem:[#allocation5 + $0x60] sm:$0xff]  ;;  %v73_v35 = vld [vmem:[#allocation5 + $0x68] sm:$0xff]  ;;  %v408_v36 = vpack.c.bf16 %v85_v32, %v84_v31  ;;  %v74_v38 = vld [vmem:[#allocation5 + $0x70] sm:$0xff]  ;;  %p504_p0 = pnand %p503_p13, %p497_p10 }
  0x3f   :  { %377 = vmatprep.subr.bf16.mxu0 %v529_v0  ;;  %v390_v37 = vpack.c.bf16 %v73_v35, %v72_v34  ;;  %v75_v39 = vld [vmem:[#allocation5 + $0x78] sm:$0xff]  ;;  %v86_v42 = vld [vmem:[#allocation7 + $0x50] sm:$0xff]  ;;  %v88_v45 = vld [vmem:[#allocation7 + $0x60] sm:$0xff] }
  0x40   :  { %400 = vmatpush3.bf16.msra.mxu1 %v399_v18  ;;  %v393_v40 = vpack.c.bf16 %v75_v39, %v74_v38  ;;  %v92_v41 = vld [vmem:[#allocation2] sm:$0xff]  ;;  %v89_v46 = vld [vmem:[#allocation7 + $0x68] sm:$0xff]  ;;  %v90_v48 = vld [vmem:[#allocation7 + $0x70] sm:$0xff] }
  0x41   :  { %401 = vmatprep.subr.bf16.mxu1 %v529_v0  ;;  %v87_v43 = vld [vmem:[#allocation7 + $0x58] sm:$0xff]  ;;  %v414_v47 = vpack.c.bf16 %v89_v46, %v88_v45 }
  0x42   :  { %379 = vmatpush3.bf16.msra.mxu0 %v378_v14  ;;  %v411_v44 = vpack.c.bf16 %v87_v43, %v86_v42  ;;  %v91_v49 = vld [vmem:[#allocation7 + $0x78] sm:$0xff] }
  0x43   :  { %380 = vmatprep.subr.bf16.mxu0 %v529_v0  ;;  %v417_v50 = vpack.c.bf16 %v91_v49, %v90_v48  ;;  %v265_v51 = vld [vmem:[%s641_s2] ss:$0 sm:$0xff] }
  0x44   :  { %403 = vmatpush3.bf16.msra.mxu1 %v402_v24  ;;  %v266_v56 = vld [vmem:[%s643_s4] ss:$0 sm:$0xff] }
  0x45   :  { %404 = vmatprep.subr.bf16.mxu1 %v529_v0 }
  0x46   :  { %382 = vmatpush3.bf16.msra.mxu0 %v381_v21 }
  0x47   :  { %383 = vmatprep.subr.bf16.mxu0 %v529_v0 }
  0x48   :  { %406 = vmatpush3.bf16.msra.mxu1 %v405_v30 }
  0x49   :  { %407 = vmatprep.subr.bf16.mxu1 %v529_v0 }
  0x4a   :  { %385 = vmatpush3.bf16.msra.mxu0 %v384_v27 }
  0x4b   :  { %386 = vmatprep.subr.bf16.mxu0 %v529_v0 }
  0x4c   :  { %409 = vmatpush3.bf16.msra.mxu1 %v408_v36 }
  0x4d   :  { %410 = vmatprep.subr.bf16.mxu1 %v529_v0 }
  0x4e   :  { %388 = vmatpush3.bf16.msra.mxu0 %v387_v33 }
  0x4f   :  { %389 = vmatprep.subr.bf16.mxu0 %v529_v0 }
  0x50   :  { %412 = vmatpush3.bf16.msra.mxu1 %v411_v44 }
  0x51   :  { %413 = vmatprep.subr.bf16.mxu1 %v529_v0 }
  0x52   :  { %391 = vmatpush3.bf16.msra.mxu0 %v390_v37 }
  0x53   :  { %392 = vmatprep.subr.bf16.mxu0 %v529_v0 }
  0x54   :  { %415 = vmatpush3.bf16.msra.mxu1 %v414_v47 }
  0x55   :  { %416 = vmatprep.subr.bf16.mxu1 %v529_v0 }
  0x56   :  { %394 = vmatpush3.bf16.msra.mxu0 %v393_v40 }
  0x58   :  { %418 = vmatpush3.bf16.msra.mxu1 %v417_v50 }
  0x59   :  { %334 = vmatmul.mubr.f32.vlgmr.msra.gmra.mrb[0].mxu0 %v92_v41 }
 0x12c   :  { %v166_v52 = vpop.f32.mrb[0].mxu0 }
 0x12d   :  { %v167_v53 = vadd.f32 %v265_v51, %v166_v52  ;;  %v335_v54 = vpop.f32.mrb[1].mxu0 }
 0x12f   :  { %428 = vtanh.f32 %v167_v53 }
 0x139   :  { %v429_v55 = vpop.eup %428 }
 0x13a   :  { %369 = vmatmul.mubr.f32.vlgmr.msra.gmra.mrb[0].mxu1 %v429_v55 }
 0x20d   :  { %v244_v57 = vpop.f32.mrb[0].mxu1 }
 0x20e   :  { %v245_v58 = vadd.f32 %v266_v56, %v244_v57  ;;  %v370_v59 = vpop.f32.mrb[1].mxu1 }
 0x210   :  { %248 = vst [vmem:[#allocation8] sm:$0xff] %v245_v58 }
 0x211   :  { %507 = shalt.err (!%p504_p0)
}
 0x212   :  { %s508_s11 = scalar_lea.hbm %s644_s5, 128 }
 0x213   :  { %p509_p1 = scmp.ne.s32.totalorder %s644_s5, %s508_s11  ;;  %p512_p2 = scmp.lt.u32.totalorder %s508_s11, %s644_s5 }
 0x215   :  { %p514_p3 = pnand %p512_p2, %p509_p1 }
 0x217   :  { %517 = shalt.err (!%p514_p3)
}
 0x218   :  { %258 = dma.vmem_to_hbm [thread:$0]  %s256_s8, 128, %s644_s5, [#allocation4]  }
 0x219   :  { %522 = dma.done.wait [#allocation4], 128  }
 0x21a   :  { %523 = vsyncadd [#allocation4], 4294967168 }
 0x21b   :  { %262 = vsyncpa [#allocation3], 1 }
 0x21c   :  { %263 = vsyncpa [#allocation6], 1 }
 0x21d   :  { %264 = vsyncpa [#allocation4], 1 }

</bundles_post_ra>
